<compile_context>
chip_gen: v6e
topology: v6e:2x2x1
jax: 0.10.0
libtpu: 0.0.40
codegen_flags: <defaults>
</compile_context>

<pallas_src>
import jax
import jax.numpy as jnp
from jax.experimental import pallas as pl
from jax.experimental.pallas import tpu as pltpu


def aug_kernel(x_ref, gath_ref, w1c_ref, b1c_ref, w2s_ref, out_ref):
    gh = w1c_ref.shape[1]  # G * Hmid (static)

    # Stage 1: all G first-layer Linears fused into ONE lane-dense matmul.
    #   h[:, g*H:(g+1)*H] = tanh(x @ W1[g] + b1[g])            h: (B, G*Hmid)
    h = jnp.tanh(
        jnp.dot(
            x_ref[...],
            w1c_ref[...],
            preferred_element_type=jnp.float32,
            precision=jax.lax.Precision.HIGHEST,
        )
        + b1c_ref[...]
    )

    # Per-sample group weights (repeated per lane) and pre-mixed bias, gathered outside.
    gw_rep = gath_ref[:, :gh]   # (B, G*Hmid)
    bias = gath_ref[:, gh:]     # (B, Hout)  == mapping[group_label] @ b2

    # Stage 2: fold the group mixture weights into h, then ONE matmul with the vertically
    # stacked second-layer weights performs every group's second Linear AND the weighted
    # sum over groups:
    #   sum_g gw[:,g] * (h_g @ W2[g]) = (h * gw_rep) @ W2_stack
    y = (
        jnp.dot(
            h * gw_rep,
            w2s_ref[...],
            preferred_element_type=jnp.float32,
            precision=jax.lax.Precision.HIGHEST,
        )
        + bias  # plain VPU add replaces the old padded K=4 bias matmul
    )

    out_ref[...] = y.astype(out_ref.dtype)


def prepare_params(mapping, W1, b1, W2, b2):
    """One-time layout precomputation (parameter-init time, NOT in the per-call path)."""
    G, Hin, Hmid = W1.shape
    Hout = W2.shape[2]

    W1_cat = jnp.transpose(W1, (1, 0, 2)).reshape(Hin, G * Hmid)   # (Hin, G*Hmid)
    b1_cat = b1.reshape(1, G * Hmid)                               # (1, G*Hmid)
    W2_stack = W2.reshape(G * Hmid, Hout)                          # (G*Hmid, Hout)

    # Lookup table combining the lane-repeated group weights with the pre-mixed b2 bias:
    #   table[label] = [ repeat(mapping[label], Hmid) | mapping[label] @ b2 ]
    mapping_rep = jnp.repeat(mapping, Hmid, axis=1)                # (n_labels, G*Hmid)
    b2_mix = jnp.dot(mapping, b2,
                     precision=jax.lax.Precision.HIGHEST)          # (n_labels, Hout)
    table = jnp.concatenate([mapping_rep, b2_mix], axis=1)         # (n_labels, G*Hmid+Hout)

    return {"W1_cat": W1_cat, "b1_cat": b1_cat, "W2_stack": W2_stack, "table": table}


@jax.jit
def augmentation_forward(x, group_label, table, W1_cat, b1_cat, W2_stack):
    """Per-call path: one gather + one fused single-step Pallas kernel."""
    B = x.shape[0]
    Hout = W2_stack.shape[1]

    gathered = jnp.take(table, group_label.astype(jnp.int32), axis=0)  # (B, G*Hmid+Hout)

    out = pl.pallas_call(
        aug_kernel,
        out_shape=jax.ShapeDtypeStruct((B, Hout), jnp.float32),
        # Single step, whole arrays resident in VMEM (tiny shapes: everything fits easily).
        in_specs=[pl.BlockSpec(memory_space=pltpu.MemorySpace.VMEM)] * 5,
        out_specs=pl.BlockSpec(memory_space=pltpu.MemorySpace.VMEM),
    )(x, gathered, W1_cat, b1_cat, W2_stack)
    return out


def reference_forward(x, group_label, mapping, W1, b1, W2, b2):
    gw = mapping[group_label.astype(jnp.int32)]            # (B, G)
    ys = []
    for g in range(W1.shape[0]):
        h = jnp.tanh(jnp.dot(x, W1[g], precision=jax.lax.Precision.HIGHEST) + b1[g])
        ys.append(jnp.dot(h, W2[g], precision=jax.lax.Precision.HIGHEST) + b2[g])
    Y = jnp.stack(ys, axis=1)                              # (B, G, H)
    return jnp.einsum("bg,bgh->bh", gw, Y,
                      precision=jax.lax.Precision.HIGHEST) # (B, H)


if __name__ == "__main__":
    B = 8          # batch
    H = 32         # hidden size of the sample_component (Linear(H,H) -> Tanh -> Linear(H,H))
    G = 4          # num_component (number of per-group augmentation components)

    key = jax.random.PRNGKey(0)
    kx, kl, k1, k2, k3, k4 = jax.random.split(key, 6)

    x = jax.random.normal(kx, (B, H), dtype=jnp.float32)
    group_label = jax.random.randint(kl, (B,), 0, G)

    # Deterministic per-group parameters (num_component deep copies -> independent params).
    W1 = jax.random.normal(k1, (G, H, H), dtype=jnp.float32) * (1.0 / jnp.sqrt(H))
    b1 = jax.random.normal(k2, (G, H), dtype=jnp.float32) * 0.01
    W2 = jax.random.normal(k3, (G, H, H), dtype=jnp.float32) * (1.0 / jnp.sqrt(H))
    b2 = jax.random.normal(k4, (G, H), dtype=jnp.float32) * 0.01

    # Deterministic `mapping` (label -> per-group mixture weights), as in the module.
    mapping = jnp.eye(G, dtype=jnp.float32) * 0.7 + 0.3 / G

    # One-time precomputation (parameter-init time).
    params = prepare_params(mapping, W1, b1, W2, b2)

    out = augmentation_forward(
        x, group_label,
        params["table"], params["W1_cat"], params["b1_cat"], params["W2_stack"],
    )
    out = jax.block_until_ready(out)

    ref = reference_forward(x, group_label, mapping, W1, b1, W2, b2)
    assert out.shape == (B, H)
    assert jnp.allclose(out, ref, atol=1e-5, rtol=1e-5), "Pallas output mismatch vs reference"

    print("KERNEL_OK")
</pallas_src>

<mosaic_0001>
module attributes {stable_mosaic.version = 11 : i64} {
  func.func @aug_kernel(%arg0: memref<8x32xf32, #tpu.memory_space<vmem>>, %arg1: memref<8x160xf32, #tpu.memory_space<vmem>>, %arg2: memref<32x128xf32, #tpu.memory_space<vmem>>, %arg3: memref<1x128xf32, #tpu.memory_space<vmem>>, %arg4: memref<128x32xf32, #tpu.memory_space<vmem>>, %arg5: memref<8x32xf32, #tpu.memory_space<vmem>>) attributes {dimension_semantics = [], scalar_prefetch = 0 : i64, scratch_operands = 0 : i64, tpu.core_type = #tpu.core_type<tc>} {
    %c0 = arith.constant 0 : index
    %c0_0 = arith.constant 0 : index
    %0 = vector.load %arg0[%c0, %c0_0] : memref<8x32xf32, #tpu.memory_space<vmem>>, vector<8x32xf32>
    %c0_1 = arith.constant 0 : index
    %c0_2 = arith.constant 0 : index
    %1 = vector.load %arg2[%c0_1, %c0_2] : memref<32x128xf32, #tpu.memory_space<vmem>>, vector<32x128xf32>
    %cst = arith.constant dense<0.000000e+00> : vector<8x128xf32>
    %2 = tpu.matmul %0, %1, %cst {dimension_numbers = #tpu.dot_dimension_numbers<[1], [0], [0], [1], [0, 0, 1, 1], [], []>, precision = #tpu.contract_precision<fp32>} : vector<8x32xf32>, vector<32x128xf32>, vector<8x128xf32> -> vector<8x128xf32>
    %c0_3 = arith.constant 0 : index
    %c0_4 = arith.constant 0 : index
    %3 = vector.load %arg3[%c0_3, %c0_4] : memref<1x128xf32, #tpu.memory_space<vmem>>, vector<1x128xf32>
    %4 = vector.broadcast %3 : vector<1x128xf32> to vector<8x128xf32>
    %5 = arith.addf %2, %4 : vector<8x128xf32>
    %6 = math.tanh %5 : vector<8x128xf32>
    %c0_5 = arith.constant 0 : index
    %c0_6 = arith.constant 0 : index
    %7 = vector.load %arg1[%c0_5, %c0_6] : memref<8x160xf32, #tpu.memory_space<vmem>>, vector<8x128xf32>
    %c0_7 = arith.constant 0 : index
    %c128 = arith.constant 128 : index
    %8 = vector.load %arg1[%c0_7, %c128] : memref<8x160xf32, #tpu.memory_space<vmem>>, vector<8x32xf32>
    %9 = arith.mulf %6, %7 : vector<8x128xf32>
    %c0_8 = arith.constant 0 : index
    %c0_9 = arith.constant 0 : index
    %10 = vector.load %arg4[%c0_8, %c0_9] : memref<128x32xf32, #tpu.memory_space<vmem>>, vector<128x32xf32>
    %cst_10 = arith.constant dense<0.000000e+00> : vector<8x32xf32>
    %11 = tpu.matmul %9, %10, %cst_10 {dimension_numbers = #tpu.dot_dimension_numbers<[1], [0], [0], [1], [0, 0, 1, 1], [], []>, precision = #tpu.contract_precision<fp32>} : vector<8x128xf32>, vector<128x32xf32>, vector<8x32xf32> -> vector<8x32xf32>
    %12 = arith.addf %11, %8 : vector<8x32xf32>
    %c0_11 = arith.constant 0 : index
    %c0_12 = arith.constant 0 : index
    %13 = vector.load %arg5[%c0_11, %c0_12] : memref<8x32xf32, #tpu.memory_space<vmem>>, vector<8x32xf32>
    tpu.vector_store %arg5[%c0_11, %c0_12], %12 {strides = array<i32>} : memref<8x32xf32, #tpu.memory_space<vmem>>, vector<8x32xf32>,
    return
  }
}

</mosaic_0001>

<bundles_post_ra>
// kernel: augmentation_forward.1
= control target key start
LH: loop header
LB: loop body
LE: loop exit
PB: predicated region body
PF: predicated region fallthrough
CT: control target
= control target key end

     0   :  { %vm33_vm0 = vcmask 261120   ;;  %v1634_v3 = vmov 0.0   ;;  %vm1635_vm1 = vmmov 0   ;;  %s2169_s0 = inlined_call_operand.vmem [shape: f32[8,32], index: 0, kind: input, shape index: {}]   ;;  %s2170_s1 = inlined_call_operand.vmem [shape: f32[8,160], index: 1, kind: input, shape index: {}]   ;;  %s2171_s2 = inlined_call_operand.vmem [shape: f32[32,128], index: 2, kind: input, shape index: {}]   ;;  %s2172_s3 = inlined_call_operand.vmem [shape: f32[1,128], index: 3, kind: input, shape index: {}]   ;;  %s2173_s4 = inlined_call_operand.vmem [shape: f32[128,32], index: 4, kind: input, shape index: {}]   ;;  %s2174_s5 = inlined_call_operand.hbm [shape: f32[8,32], index: 5, kind: output, shape index: {}]  }
   0x1   :  { %v25_v0 = vld [vmem:[%s2171_s2 + $0x18] sm:$0xff]  ;;  %v24_v1 = vld [vmem:[%s2171_s2 + $0x10] sm:$0xff]  ;;  %v23_v2 = vld [vmem:[%s2171_s2 + $0x8] sm:$0xff]  ;;  %1331 = vmatprep.subr.mxu0 %v1634_v3  ;;  %1342 = vmatprep.subr.mxu1 %v1634_v3 }
   0x2   :  { %v1677_v4 = vand.u32 4294901760, %v25_v0  ;;  %v1679_v5 = vand.u32 4294901760, %v24_v1  ;;  %v1681_v6 = vand.u32 4294901760, %v23_v2  ;;  %v22_v7 = vld [vmem:[%s2171_s2] sm:$0xff]  ;;  %1339 = vmatprep.mubr.msk.f32.mxu0 %vm1635_vm1, %v1634_v3  ;;  %1350 = vmatprep.mubr.msk.f32.mxu1 %vm1635_vm1, %v1634_v3 }
   0x3   :  { %v21_v8 = vld [vmem:[%s2169_s0] sm:$0xff]  ;;  %v1690_v9 = vand.u32 4294901760, %v22_v7 }
   0x4   :  { %v35_v10 = vsel %vm33_vm0, %v21_v8, 0 }
   0x5   :  { %10 = vsyncpa [#allocation3], 0  ;;  %1332 = vmatpush3.msra.mxu0 %v1677_v4  ;;  %v142_v11 = vsub.f32 %v25_v0, %v1677_v4  ;;  %v1699_v12 = vand.u32 4294901760, %v35_v10  ;;  %v149_v13 = vsub.f32 %v24_v1, %v1679_v5  ;;  %v156_v14 = vsub.f32 %v23_v2, %v1681_v6  ;;  %v541_v32 = vld [vmem:[%s2173_s4 + $0x78] sm:$0xff]  ;;  %v540_v34 = vld [vmem:[%s2173_s4 + $0x70] sm:$0xff]  ;;  %s1636_s10 = smov [#allocation2]  }
   0x6   :  { %1333 = vmatprep.subr.mxu0 %v1634_v3  ;;  %v163_v15 = vsub.f32 %v22_v7, %v1690_v9  ;;  %v1758_v33 = vand.u32 4294901760, %v541_v32  ;;  %v1766_v36 = vand.u32 4294901760, %v540_v34  ;;  %v539_v37 = vld [vmem:[%s2173_s4 + $0x68] sm:$0xff]  ;;  %v538_v41 = vld [vmem:[%s2173_s4 + $0x60] sm:$0xff]  ;;  %v537_v46 = vld [vmem:[%s2173_s4 + $0x58] sm:$0xff]  ;;  %s1190_s11 = sshll.u32 %s1636_s10, 4  ;;  %s1191_s11 = int_to_ptr.vmem [resolvable:$true] %s1190_s11 }
   0x7   :  { %1334 = vmatpush3.msra.mxu0 %v1679_v5  ;;  %v143_v16 = vand.u32 4294901760, %v142_v11  ;;  %v107_v17 = vsub.f32 %v35_v10, %v1699_v12  ;;  %v150_v18 = vand.u32 4294901760, %v149_v13  ;;  %v157_v19 = vand.u32 4294901760, %v156_v14  ;;  %v536_v52 = vld [vmem:[%s2173_s4 + $0x50] sm:$0xff]  ;;  %v535_v58 = vld [vmem:[%s2173_s4 + $0x48] sm:$0xff]  ;;  %v534_v0 = vld [vmem:[%s2173_s4 + $0x40] sm:$0xff]  ;;  %p1617_p1 = scmp.lt.s32.totalorder %s1191_s11, %s1191_s11 }
   0x8   :  { %1335 = vmatprep.subr.mxu0 %v1634_v3  ;;  %v164_v20 = vand.u32 4294901760, %v163_v15  ;;  %v1764_v35 = vsub.f32 %v541_v32, %v1758_v33  ;;  %v1775_v39 = vsub.f32 %v540_v34, %v1766_v36  ;;  %v1777_v40 = vand.u32 4294901760, %v539_v37  ;;  %v533_v7 = vld [vmem:[%s2173_s4 + $0x38] sm:$0xff]  ;;  %s1612_s12 = scalar_lea.vmem %s1191_s11, 128 }
   0x9   :  { %1336 = vmatpush3.msra.mxu0 %v1681_v6  ;;  %v144_v21 = vsub.f32 %v142_v11, %v143_v16  ;;  %v108_v22 = vand.u32 4294901760, %v107_v17  ;;  %v151_v23 = vsub.f32 %v149_v13, %v150_v18  ;;  %v158_v24 = vsub.f32 %v156_v14, %v157_v19  ;;  %p1613_p0 = scmp.ne.s32.totalorder %s1191_s11, %s1612_s12  ;;  %p1618_p2 = scmp.lt.s32.totalorder %s1612_s12, %s1612_s12 }
   0xa   :  { %1337 = vmatprep.subr.mxu0 %v1634_v3  ;;  %v165_v28 = vsub.f32 %v163_v15, %v164_v20  ;;  %v636_v38 = vand.u32 4294901760, %v1764_v35  ;;  %v643_v43 = vand.u32 4294901760, %v1775_v39  ;;  %v1789_v44 = vsub.f32 %v539_v37, %v1777_v40 }
   0xb   :  { %1338 = vmatpush3.msra.mxu0 %v1690_v9  ;;  %v145_v25 = vand.u32 4294901760, %v144_v21  ;;  %v109_v26 = vsub.f32 %v107_v17, %v108_v22  ;;  %v152_v27 = vand.u32 4294901760, %v151_v23  ;;  %v159_v30 = vand.u32 4294901760, %v158_v24  ;;  %p1619_p3 = por %p1618_p2, %p1617_p1 }
   0xc   :  { %1353 = vmatprep.subr.mxu0 %v1634_v3  ;;  %v166_v31 = vand.u32 4294901760, %v165_v28  ;;  %v637_v42 = vsub.f32 %v1764_v35, %v636_v38  ;;  %v1791_v45 = vand.u32 4294901760, %v538_v41  ;;  %v644_v48 = vsub.f32 %v1775_v39, %v643_v43 }
   0xd   :  { %1343 = vmatpush3.msra.mxu1 %v145_v25  ;;  %v110_v29 = vand.u32 4294901760, %v109_v26  ;;  %v650_v49 = vand.u32 4294901760, %v1789_v44  ;;  %v1806_v51 = vand.u32 4294901760, %v537_v46  ;;  %v1816_v56 = vand.u32 4294901760, %v536_v52  ;;  %v530_v25 = vld [vmem:[%s2173_s4 + $0x20] sm:$0xff]  ;;  %p1620_p4 = pnand %p1619_p3, %p1613_p0 }
   0xe   :  { %1344 = vmatprep.subr.mxu1 %v1634_v3  ;;  %v638_v47 = vand.u32 4294901760, %v637_v42  ;;  %v1803_v50 = vsub.f32 %v538_v41, %v1791_v45  ;;  %v645_v53 = vand.u32 4294901760, %v644_v48  ;;  %v1832_v62 = vand.u32 4294901760, %v535_v58  ;;  %v528_v42 = vld [vmem:[%s2173_s4 + $0x10] sm:$0xff] }
   0xf   :  { %1340 = vmatmul.mubr.f32.vlgmr.msra.gmra.mxu0 %v110_v29  ;;  %1345 = vmatpush3.msra.mxu1 %v152_v27  ;;  %v651_v54 = vsub.f32 %v1789_v44, %v650_v49  ;;  %v1820_v57 = vsub.f32 %v537_v46, %v1806_v51  ;;  %v1830_v61 = vsub.f32 %v536_v52, %v1816_v56  ;;  %v1907_v29 = vand.u32 4294901760, %v530_v25  ;;  %v527_v46 = vld [vmem:[%s2173_s4 + $0x8] sm:$0xff] }
  0x10   :  { %1354 = vmatpush3.msra.mxu0 %v142_v11  ;;  %1346 = vmatprep.subr.mxu1 %v1634_v3  ;;  %v657_v55 = vand.u32 4294901760, %v1803_v50  ;;  %v1863_v11 = vand.u32 4294901760, %v533_v7  ;;  %v1935_v52 = vand.u32 4294901760, %v528_v42 }
  0x11   :  { %1355 = vmatprep.subr.mxu0 %v1634_v3  ;;  %1347 = vmatpush3.msra.mxu1 %v159_v30  ;;  %v652_v59 = vand.u32 4294901760, %v651_v54  ;;  %v664_v63 = vand.u32 4294901760, %v1820_v57  ;;  %v671_v2 = vand.u32 4294901760, %v1830_v61  ;;  %v1918_v37 = vsub.f32 %v530_v25, %v1907_v29 }
  0x12   :  { %1356 = vmatpush3.msra.mxu0 %v149_v13  ;;  %1348 = vmatprep.subr.mxu1 %v1634_v3  ;;  %v658_v60 = vsub.f32 %v1803_v50, %v657_v55  ;;  %v532_v13 = vld [vmem:[%s2173_s4 + $0x30] sm:$0xff] }
  0x13   :  { %1357 = vmatprep.subr.mxu0 %v1634_v3  ;;  %1349 = vmatpush3.msra.mxu1 %v166_v31  ;;  %v672_v8 = vsub.f32 %v1830_v61, %v671_v2  ;;  %v529_v31 = vld [vmem:[%s2173_s4 + $0x18] sm:$0xff] }
  0x14   :  { %1358 = vmatpush3.msra.mxu0 %v156_v14  ;;  %1351 = vmatmul.mubr.f32.vlgmr.msra.gmra.mxu1 %v1699_v12  ;;  %v659_v1 = vand.u32 4294901760, %v658_v60  ;;  %v1920_v41 = vand.u32 4294901760, %v529_v31 }
  0x15   :  { %1359 = vmatprep.subr.mxu0 %v1634_v3  ;;  %1364 = vmatprep.subr.mxu1 %v1634_v3  ;;  %v673_v14 = vand.u32 4294901760, %v672_v8 }
  0x16   :  { %1360 = vmatpush3.msra.mxu0 %v163_v15  ;;  %1365 = vmatpush3.msra.mxu1 %v1677_v4  ;;  %v1948_v60 = vsub.f32 %v529_v31, %v1920_v41 }
  0x17   :  { %1361 = vmatprep.mubr.msk.f32.mxu0 %vm1635_vm1, %v1634_v3  ;;  %1366 = vmatprep.subr.mxu1 %v1634_v3 }
  0x18   :  { %1375 = vmatprep.subr.mxu0 %v1634_v3  ;;  %1362 = vmatmul.mubr.f32.vlgmr.msra.gmra.mxu0 %v107_v17  ;;  %v1876_v17 = vsub.f32 %v533_v7, %v1863_v11 }
  0x19   :  { %1367 = vmatpush3.msra.mxu1 %v1679_v5  ;;  %1376 = vmatpush3.msra.mxu0 %v143_v16 }
  0x1a   :  { %1368 = vmatprep.subr.mxu1 %v1634_v3  ;;  %1377 = vmatprep.subr.mxu0 %v1634_v3 }
  0x1b   :  { %1369 = vmatpush3.msra.mxu1 %v1681_v6  ;;  %1378 = vmatpush3.msra.mxu0 %v150_v18  ;;  %v1879_v18 = vand.u32 4294901760, %v532_v13 }
  0x1c   :  { %1370 = vmatprep.subr.mxu1 %v1634_v3  ;;  %1379 = vmatprep.subr.mxu0 %v1634_v3 }
  0x1d   :  { %1371 = vmatpush3.msra.mxu1 %v1690_v9  ;;  %1372 = vmatprep.mubr.msk.f32.mxu1 %vm1635_vm1, %v1634_v3  ;;  %v1894_v24 = vsub.f32 %v532_v13, %v1879_v18  ;;  %v2178_v13 = vand.u32 4294901760, %v1948_v60 }
  0x1e   :  { %1380 = vmatpush3.msra.mxu0 %v157_v19  ;;  %1373 = vmatmul.mubr.f32.vlgmr.msra.gmra.mxu1 %v108_v22  ;;  %v531_v19 = vld [vmem:[%s2173_s4 + $0x28] sm:$0xff]  ;;  %v692_v22 = vand.u32 4294901760, %v1876_v17 }
  0x1f   :  { %1381 = vmatprep.subr.mxu0 %v1634_v3  ;;  %1386 = vmatprep.subr.mxu1 %v1634_v3  ;;  %v1890_v23 = vand.u32 4294901760, %v531_v19  ;;  %v699_v30 = vand.u32 4294901760, %v1894_v24 }
  0x20   :  { %1382 = vmatpush3.msra.mxu0 %v164_v20  ;;  %1383 = vmatprep.mubr.msk.f32.mxu0 %vm1635_vm1, %v1634_v3  ;;  %v693_v27 = vsub.f32 %v1876_v17, %v692_v22 }
  0x21   :  { %1387 = vmatpush3.msra.mxu1 %v1677_v4  ;;  %1384 = vmatmul.mubr.f32.vlgmr.msra.gmra.mxu0 %v1699_v12  ;;  %v1843_v4 = vsub.f32 %v535_v58, %v1832_v62  ;;  %v1905_v28 = vsub.f32 %v531_v19, %v1890_v23  ;;  %v700_v48 = vsub.f32 %v1894_v24, %v699_v30 }
  0x22   :  { %1388 = vmatprep.subr.mxu1 %v1634_v3  ;;  %1394 = vmatprep.mubr.msk.f32.mxu1 %vm1635_vm1, %v1634_v3  ;;  %v694_v32 = vand.u32 4294901760, %v693_v27 }
  0x23   :  { %1389 = vmatpush3.msra.mxu1 %v1679_v5  ;;  %1397 = vmatprep.subr.mxu0 %v1634_v3  ;;  %v1845_v5 = vand.u32 4294901760, %v534_v0  ;;  %v706_v34 = vand.u32 4294901760, %v1905_v28 }
  0x24   :  { %1390 = vmatprep.subr.mxu1 %v1634_v3  ;;  %1429 = vmatprep.mubr.msk.f32.mxu0 %vm1635_vm1, %v1634_v3 }
  0x25   :  { %1391 = vmatpush3.msra.mxu1 %v1681_v6  ;;  %1398 = vmatpush3.msra.mxu0 %v1758_v33  ;;  %v665_v6 = vsub.f32 %v1820_v57, %v664_v63  ;;  %v1861_v10 = vsub.f32 %v534_v0, %v1845_v5  ;;  %v707_v58 = vsub.f32 %v1905_v28, %v706_v34  ;;  %v701_v0 = vand.u32 4294901760, %v700_v48 }
  0x26   :  { %1392 = vmatprep.subr.mxu1 %v1634_v3  ;;  %1399 = vmatprep.subr.mxu0 %v1634_v3 }
  0x27   :  { %1393 = vmatpush3.msra.mxu1 %v1690_v9  ;;  %1400 = vmatpush3.msra.mxu0 %v1766_v36  ;;  %v678_v9 = vand.u32 4294901760, %v1843_v4  ;;  %v685_v16 = vand.u32 4294901760, %v1861_v10  ;;  %v708_v8 = vand.u32 4294901760, %v707_v58 }
  0x28   :  { %1395 = vmatmul.mubr.f32.vlgmr.msra.gmra.mxu1 %v1699_v12  ;;  %1432 = vmatprep.subr.mxu1 %v1634_v3  ;;  %v666_v12 = vand.u32 4294901760, %v665_v6 }
  0x29   :  { %1464 = vmatprep.mubr.msk.f32.mxu1 %vm1635_vm1, %v1634_v3  ;;  %1401 = vmatprep.subr.mxu0 %v1634_v3  ;;  %v679_v15 = vsub.f32 %v1843_v4, %v678_v9  ;;  %v686_v21 = vsub.f32 %v1861_v10, %v685_v16 }
  0x2a   :  { %1402 = vmatpush3.msra.mxu0 %v1777_v40  ;;  %1433 = vmatpush3.msra.mxu1 %v638_v47  ;;  %v526_v47 = vld [vmem:[%s2173_s4] sm:$0xff] }
  0x2b   :  { %1403 = vmatprep.subr.mxu0 %v1634_v3  ;;  %1434 = vmatprep.subr.mxu1 %v1634_v3  ;;  %v680_v20 = vand.u32 4294901760, %v679_v15  ;;  %v687_v26 = vand.u32 4294901760, %v686_v21  ;;  %v1940_v54 = vand.u32 4294901760, %v526_v47  ;;  %v721_v21 = vsub.f32 %v1948_v60, %v2178_v13  ;;  %v523_v13 = vld [vmem:[%s2170_s1] sm:$0xff] }
  0x2c   :  { %1404 = vmatpush3.msra.mxu0 %v1791_v45  ;;  %1435 = vmatpush3.msra.mxu1 %v645_v53  ;;  %v1937_v53 = vand.u32 4294901760, %v527_v46 }
  0x2d   :  { %1405 = vmatprep.subr.mxu0 %v1634_v3  ;;  %1436 = vmatprep.subr.mxu1 %v1634_v3  ;;  %v1958_v7 = vsub.f32 %v526_v47, %v1940_v54  ;;  %v722_v27 = vand.u32 4294901760, %v721_v21 }
  0x2e   :  { %1406 = vmatpush3.msra.mxu0 %v1806_v51  ;;  %1437 = vmatpush3.msra.mxu1 %v652_v59  ;;  %v2179_v59 = vand.u32 4294901760, %v1918_v37  ;;  %v1955_v6 = vsub.f32 %v527_v46, %v1937_v53 }
  0x2f   :  { %1407 = vmatprep.subr.mxu0 %v1634_v3  ;;  %1438 = vmatprep.subr.mxu1 %v1634_v3  ;;  %v2175_v19 = vand.u32 4294901760, %v1958_v7 }
  0x30   :  { %1408 = vmatpush3.msra.mxu0 %v1816_v56  ;;  %1439 = vmatpush3.msra.mxu1 %v659_v1  ;;  %v1952_v1 = vsub.f32 %v528_v42, %v1935_v52  ;;  %v2176_v15 = vand.u32 4294901760, %v1955_v6 }
  0x31   :  { %1409 = vmatprep.subr.mxu0 %v1634_v3  ;;  %1440 = vmatprep.subr.mxu1 %v1634_v3 }
  0x32   :  { %1410 = vmatpush3.msra.mxu0 %v1832_v62  ;;  %1441 = vmatpush3.msra.mxu1 %v666_v12  ;;  %v714_v12 = vsub.f32 %v1918_v37, %v2179_v59 }
  0x33   :  { %1411 = vmatprep.subr.mxu0 %v1634_v3  ;;  %1442 = vmatprep.subr.mxu1 %v1634_v3 }
  0x34   :  { %1412 = vmatpush3.msra.mxu0 %v1845_v5  ;;  %1443 = vmatpush3.msra.mxu1 %v673_v14  ;;  %v2177_v14 = vand.u32 4294901760, %v1952_v1 }
  0x35   :  { %1413 = vmatprep.subr.mxu0 %v1634_v3  ;;  %1444 = vmatprep.subr.mxu1 %v1634_v3 }
  0x36   :  { %1414 = vmatpush3.msra.mxu0 %v1863_v11  ;;  %1445 = vmatpush3.msra.mxu1 %v680_v20  ;;  %v715_v20 = vand.u32 4294901760, %v714_v12  ;;  %v728_v25 = vsub.f32 %v1952_v1, %v2177_v14 }
  0x37   :  { %1415 = vmatprep.subr.mxu0 %v1634_v3  ;;  %1446 = vmatprep.subr.mxu1 %v1634_v3 }
  0x38   :  { %1416 = vmatpush3.msra.mxu0 %v1879_v18  ;;  %1447 = vmatpush3.msra.mxu1 %v687_v26  ;;  %v735_v26 = vsub.f32 %v1955_v6, %v2176_v15  ;;  %v729_v31 = vand.u32 4294901760, %v728_v25 }
  0x39   :  { %1417 = vmatprep.subr.mxu0 %v1634_v3  ;;  %1448 = vmatprep.subr.mxu1 %v1634_v3 }
  0x3a   :  { %1418 = vmatpush3.msra.mxu0 %v1890_v23  ;;  %1449 = vmatpush3.msra.mxu1 %v694_v32  ;;  %v742_v32 = vsub.f32 %v1958_v7, %v2175_v19  ;;  %v736_v42 = vand.u32 4294901760, %v735_v26 }
  0x3b   :  { %1419 = vmatprep.subr.mxu0 %v1634_v3  ;;  %1450 = vmatprep.subr.mxu1 %v1634_v3 }
  0x3c   :  { %1420 = vmatpush3.msra.mxu0 %v1907_v29  ;;  %1451 = vmatpush3.msra.mxu1 %v701_v0  ;;  %v743_v46 = vand.u32 4294901760, %v742_v32  ;;  %v1198_v0 = vld [vmem:[%s2172_s3] ss:$0 sm:$0xff] }
  0x3d   :  { %1421 = vmatprep.subr.mxu0 %v1634_v3  ;;  %1452 = vmatprep.subr.mxu1 %v1634_v3 }
  0x3e   :  { %1422 = vmatpush3.msra.mxu0 %v1920_v41  ;;  %1453 = vmatpush3.msra.mxu1 %v708_v8 }
  0x3f   :  { %1423 = vmatprep.subr.mxu0 %v1634_v3  ;;  %1454 = vmatprep.subr.mxu1 %v1634_v3 }
  0x40   :  { %1424 = vmatpush3.msra.mxu0 %v1935_v52  ;;  %1455 = vmatpush3.msra.mxu1 %v715_v20 }
  0x41   :  { %1425 = vmatprep.subr.mxu0 %v1634_v3  ;;  %1456 = vmatprep.subr.mxu1 %v1634_v3 }
  0x42   :  { %1426 = vmatpush3.msra.mxu0 %v1937_v53  ;;  %1457 = vmatpush3.msra.mxu1 %v722_v27 }
  0x43   :  { %1427 = vmatprep.subr.mxu0 %v1634_v3  ;;  %1458 = vmatprep.subr.mxu1 %v1634_v3 }
  0x44   :  { %1428 = vmatpush3.msra.mxu0 %v1940_v54  ;;  %1459 = vmatpush3.msra.mxu1 %v729_v31 }
  0x45   :  { %1467 = vmatprep.subr.mxu0 %v1634_v3  ;;  %1460 = vmatprep.subr.mxu1 %v1634_v3 }
  0x46   :  { %1461 = vmatpush3.msra.mxu1 %v736_v42 }
  0x47   :  { %1462 = vmatprep.subr.mxu1 %v1634_v3 }
  0x48   :  { %1463 = vmatpush3.msra.mxu1 %v743_v46 }
  0x49   :  { %1502 = vmatprep.subr.mxu1 %v1634_v3 }
  0xcf   :  { %v112_v47 = vpop.f32.mrf.mxu0 }
  0xd0   :  { %v113_v20 = vadd.f32 %v1198_v0, %v112_v47 }
  0xd1   :  { %v1341_v48 = vpop.f32.mrf.mxu0 }
  0xd4   :  { %v203_v58 = vpop.f32.mrf.mxu1 }
  0xd5   :  { %v204_v25 = vadd.f32 %v203_v58, %v113_v20 }
  0xd6   :  { %v1352_v8 = vpop.f32.mrf.mxu1 }
  0xd8   :  { %v283_v12 = vpop.f32.mrf.mxu0 }
  0xd9   :  { %v284_v31 = vadd.f32 %v283_v12, %v204_v25 }
  0xda   :  { %v1363_v21 = vpop.f32.mrf.mxu0 }
  0xde   :  { %v360_v26 = vpop.f32.mrf.mxu1 }
  0xdf   :  { %v361_v42 = vadd.f32 %v360_v26, %v284_v31 }
  0xe0   :  { %v1374_v27 = vpop.f32.mrf.mxu1 }
  0xe1   :  { %v443_v32 = vpop.f32.mrf.mxu0 }
  0xe2   :  { %v444_v19 = vadd.f32 %v443_v32, %v361_v42 }
  0xe3   :  { %v1385_v46 = vpop.f32.mrf.mxu0 }
  0xe8   :  { %v518_v15 = vpop.f32.mrf.mxu1 }
  0xe9   :  { %v519_v14 = vadd.f32 %v518_v15, %v444_v19 }
  0xea   :  { %v1396_v48 = vpop.f32.mrf.mxu1 }
  0xeb   :  { %1610 = vtanh.f32 %v519_v14 }
  0xf8   :  { %v1611_v8 = vpop.eup %1610 }
  0xf9   :  { %v525_v59 = vmul.f32 %v1611_v8, %v523_v13 }
  0xfb   :  { %v2001_v47 = vand.u32 4294901760, %v525_v59 }
  0xfd   :  { %v2004_v58 = vsub.f32 %v525_v59, %v2001_v47  ;;  %1465 = vmatmul.mubr.f32.vlgmr.msra.gmra.mxu1 %v2001_v47 }
  0xfe   :  { %1503 = vmatpush3.msra.mxu1 %v1758_v33  ;;  %1534 = vmatprep.mubr.msk.f32.mxu1 %vm1635_vm1, %v1634_v3 }
  0xff   :  { %1504 = vmatprep.subr.mxu1 %v1634_v3  ;;  %v625_v14 = vand.u32 4294901760, %v2004_v58 }
 0x100   :  { %1505 = vmatpush3.msra.mxu1 %v1766_v36 }
 0x101   :  { %1506 = vmatprep.subr.mxu1 %v1634_v3  ;;  %v626_v13 = vsub.f32 %v2004_v58, %v625_v14 }
 0x102   :  { %1507 = vmatpush3.msra.mxu1 %v1777_v40 }
 0x103   :  { %1508 = vmatprep.subr.mxu1 %v1634_v3  ;;  %v627_v59 = vand.u32 4294901760, %v626_v13 }
 0x104   :  { %1509 = vmatpush3.msra.mxu1 %v1791_v45 }
 0x105   :  { %1510 = vmatprep.subr.mxu1 %v1634_v3  ;;  %1430 = vmatmul.mubr.f32.vlgmr.msra.gmra.mxu0 %v627_v59 }
 0x106   :  { %1468 = vmatpush3.msra.mxu0 %v1764_v35  ;;  %1511 = vmatpush3.msra.mxu1 %v1806_v51  ;;  %v2181_v35 = vand.u32 4294901760, %v1948_v60 }
 0x107   :  { %1469 = vmatprep.subr.mxu0 %v1634_v3  ;;  %1512 = vmatprep.subr.mxu1 %v1634_v3 }
 0x108   :  { %1470 = vmatpush3.msra.mxu0 %v1775_v39  ;;  %1513 = vmatpush3.msra.mxu1 %v1816_v56  ;;  %v2184_v39 = vand.u32 4294901760, %v1958_v7 }
 0x109   :  { %1471 = vmatprep.subr.mxu0 %v1634_v3  ;;  %1514 = vmatprep.subr.mxu1 %v1634_v3 }
 0x10a   :  { %1472 = vmatpush3.msra.mxu0 %v1789_v44  ;;  %1515 = vmatpush3.msra.mxu1 %v1832_v62 }
 0x10b   :  { %1473 = vmatprep.subr.mxu0 %v1634_v3  ;;  %1516 = vmatprep.subr.mxu1 %v1634_v3 }
 0x10c   :  { %1474 = vmatpush3.msra.mxu0 %v1803_v50  ;;  %1517 = vmatpush3.msra.mxu1 %v1845_v5 }
 0x10d   :  { %1475 = vmatprep.subr.mxu0 %v1634_v3  ;;  %1518 = vmatprep.subr.mxu1 %v1634_v3 }
 0x10e   :  { %1476 = vmatpush3.msra.mxu0 %v1820_v57  ;;  %1519 = vmatpush3.msra.mxu1 %v1863_v11 }
 0x10f   :  { %1477 = vmatprep.subr.mxu0 %v1634_v3  ;;  %1520 = vmatprep.subr.mxu1 %v1634_v3 }
 0x110   :  { %1478 = vmatpush3.msra.mxu0 %v1830_v61  ;;  %1521 = vmatpush3.msra.mxu1 %v1879_v18 }
 0x111   :  { %1479 = vmatprep.subr.mxu0 %v1634_v3  ;;  %1522 = vmatprep.subr.mxu1 %v1634_v3 }
 0x112   :  { %1480 = vmatpush3.msra.mxu0 %v1843_v4  ;;  %1523 = vmatpush3.msra.mxu1 %v1890_v23 }
 0x113   :  { %1481 = vmatprep.subr.mxu0 %v1634_v3  ;;  %1524 = vmatprep.subr.mxu1 %v1634_v3 }
 0x114   :  { %1482 = vmatpush3.msra.mxu0 %v1861_v10  ;;  %1525 = vmatpush3.msra.mxu1 %v1907_v29 }
 0x115   :  { %1483 = vmatprep.subr.mxu0 %v1634_v3  ;;  %1526 = vmatprep.subr.mxu1 %v1634_v3 }
 0x116   :  { %1484 = vmatpush3.msra.mxu0 %v1876_v17  ;;  %1527 = vmatpush3.msra.mxu1 %v1920_v41 }
 0x117   :  { %1485 = vmatprep.subr.mxu0 %v1634_v3  ;;  %1528 = vmatprep.subr.mxu1 %v1634_v3 }
 0x118   :  { %1486 = vmatpush3.msra.mxu0 %v1894_v24  ;;  %1529 = vmatpush3.msra.mxu1 %v1935_v52 }
 0x119   :  { %1487 = vmatprep.subr.mxu0 %v1634_v3  ;;  %1530 = vmatprep.subr.mxu1 %v1634_v3 }
 0x11a   :  { %1488 = vmatpush3.msra.mxu0 %v1905_v28  ;;  %1531 = vmatpush3.msra.mxu1 %v1937_v53 }
 0x11b   :  { %1489 = vmatprep.subr.mxu0 %v1634_v3  ;;  %1532 = vmatprep.subr.mxu1 %v1634_v3 }
 0x11c   :  { %1490 = vmatpush3.msra.mxu0 %v1918_v37  ;;  %1533 = vmatpush3.msra.mxu1 %v1940_v54 }
 0x11d   :  { %1491 = vmatprep.subr.mxu0 %v1634_v3  ;;  %1535 = vmatmul.mubr.f32.vlgmr.msra.gmra.mxu1 %v625_v14 }
 0x11e   :  { %1572 = vmatprep.subr.mxu1 %v1634_v3  ;;  %1492 = vmatpush3.msra.mxu0 %v1948_v60 }
 0x11f   :  { %1573 = vmatpush3.msra.mxu1 %v1758_v33  ;;  %1493 = vmatprep.subr.mxu0 %v1634_v3  ;;  %v2180_v33 = vand.u32 4294901760, %v1918_v37 }
 0x120   :  { %1574 = vmatprep.subr.mxu1 %v1634_v3  ;;  %1494 = vmatpush3.msra.mxu0 %v1952_v1 }
 0x121   :  { %1575 = vmatpush3.msra.mxu1 %v1766_v36  ;;  %1495 = vmatprep.subr.mxu0 %v1634_v3  ;;  %v2182_v36 = vand.u32 4294901760, %v1952_v1 }
 0x122   :  { %1576 = vmatprep.subr.mxu1 %v1634_v3  ;;  %1496 = vmatpush3.msra.mxu0 %v1955_v6 }
 0x123   :  { %1577 = vmatpush3.msra.mxu1 %v1777_v40  ;;  %1497 = vmatprep.subr.mxu0 %v1634_v3 }
 0x124   :  { %1578 = vmatprep.subr.mxu1 %v1634_v3  ;;  %1498 = vmatpush3.msra.mxu0 %v1958_v7 }
 0x125   :  { %1499 = vmatprep.mubr.msk.f32.mxu0 %vm1635_vm1, %v1634_v3  ;;  %1579 = vmatpush3.msra.mxu1 %v1791_v45 }
 0x126   :  { %1500 = vmatmul.mubr.f32.vlgmr.msra.gmra.mxu0 %v2004_v58  ;;  %1537 = vmatprep.subr.mxu0 %v1634_v3 }
 0x127   :  { %1580 = vmatprep.subr.mxu1 %v1634_v3  ;;  %1538 = vmatpush3.msra.mxu0 %v636_v38  ;;  %v2183_v38 = vand.u32 4294901760, %v1955_v6 }
 0x128   :  { %1581 = vmatpush3.msra.mxu1 %v1806_v51  ;;  %1539 = vmatprep.subr.mxu0 %v1634_v3 }
 0x129   :  { %1582 = vmatprep.subr.mxu1 %v1634_v3  ;;  %1540 = vmatpush3.msra.mxu0 %v643_v43 }
 0x12a   :  { %1583 = vmatpush3.msra.mxu1 %v1816_v56  ;;  %1541 = vmatprep.subr.mxu0 %v1634_v3  ;;  %v524_v56 = vld [vmem:[%s2170_s1 + $0x8] sm:$0xff] }
 0x12b   :  { %1584 = vmatprep.subr.mxu1 %v1634_v3  ;;  %1542 = vmatpush3.msra.mxu0 %v650_v49 }
 0x12c   :  { %1585 = vmatpush3.msra.mxu1 %v1832_v62  ;;  %1543 = vmatprep.subr.mxu0 %v1634_v3 }
 0x12d   :  { %1586 = vmatprep.subr.mxu1 %v1634_v3  ;;  %1544 = vmatpush3.msra.mxu0 %v657_v55 }
 0x12e   :  { %1587 = vmatpush3.msra.mxu1 %v1845_v5  ;;  %1545 = vmatprep.subr.mxu0 %v1634_v3 }
 0x12f   :  { %1588 = vmatprep.subr.mxu1 %v1634_v3  ;;  %1546 = vmatpush3.msra.mxu0 %v664_v63 }
 0x130   :  { %1589 = vmatpush3.msra.mxu1 %v1863_v11  ;;  %1547 = vmatprep.subr.mxu0 %v1634_v3 }
 0x131   :  { %1590 = vmatprep.subr.mxu1 %v1634_v3  ;;  %1548 = vmatpush3.msra.mxu0 %v671_v2 }
 0x132   :  { %1591 = vmatpush3.msra.mxu1 %v1879_v18  ;;  %1549 = vmatprep.subr.mxu0 %v1634_v3 }
 0x133   :  { %1592 = vmatprep.subr.mxu1 %v1634_v3  ;;  %1550 = vmatpush3.msra.mxu0 %v678_v9 }
 0x134   :  { %1593 = vmatpush3.msra.mxu1 %v1890_v23  ;;  %1551 = vmatprep.subr.mxu0 %v1634_v3 }
 0x135   :  { %1594 = vmatprep.subr.mxu1 %v1634_v3  ;;  %1552 = vmatpush3.msra.mxu0 %v685_v16 }
 0x136   :  { %1595 = vmatpush3.msra.mxu1 %v1907_v29  ;;  %1553 = vmatprep.subr.mxu0 %v1634_v3 }
 0x137   :  { %1596 = vmatprep.subr.mxu1 %v1634_v3  ;;  %1554 = vmatpush3.msra.mxu0 %v692_v22 }
 0x138   :  { %1597 = vmatpush3.msra.mxu1 %v1920_v41  ;;  %1555 = vmatprep.subr.mxu0 %v1634_v3 }
 0x139   :  { %1598 = vmatprep.subr.mxu1 %v1634_v3  ;;  %1556 = vmatpush3.msra.mxu0 %v699_v30 }
 0x13a   :  { %1599 = vmatpush3.msra.mxu1 %v1935_v52  ;;  %1557 = vmatprep.subr.mxu0 %v1634_v3 }
 0x13b   :  { %1600 = vmatprep.subr.mxu1 %v1634_v3  ;;  %1558 = vmatpush3.msra.mxu0 %v706_v34 }
 0x13c   :  { %1601 = vmatpush3.msra.mxu1 %v1937_v53  ;;  %1559 = vmatprep.subr.mxu0 %v1634_v3 }
 0x13d   :  { %1602 = vmatprep.subr.mxu1 %v1634_v3  ;;  %1560 = vmatpush3.msra.mxu0 %v2180_v33 }
 0x13e   :  { %1603 = vmatpush3.msra.mxu1 %v1940_v54  ;;  %1604 = vmatprep.mubr.msk.f32.mxu1 %vm1635_vm1, %v1634_v3 }
 0x13f   :  { %1561 = vmatprep.subr.mxu0 %v1634_v3  ;;  %1605 = vmatmul.mubr.f32.vlgmr.msra.gmra.mxu1 %v2001_v47 }
 0x140   :  { %1562 = vmatpush3.msra.mxu0 %v2181_v35  ;;  %1569 = vmatprep.mubr.msk.f32.mxu0 %vm1635_vm1, %v1634_v3 }
 0x141   :  { %1563 = vmatprep.subr.mxu0 %v1634_v3 }
 0x142   :  { %1564 = vmatpush3.msra.mxu0 %v2182_v36 }
 0x143   :  { %1565 = vmatprep.subr.mxu0 %v1634_v3 }
 0x144   :  { %1566 = vmatpush3.msra.mxu0 %v2183_v38 }
 0x145   :  { %1567 = vmatprep.subr.mxu0 %v1634_v3 }
 0x146   :  { %1568 = vmatpush3.msra.mxu0 %v2184_v39 }
 0x147   :  { %1570 = vmatmul.mubr.f32.vlgmr.msra.gmra.mxu0 %v2001_v47 }
 0x1bd   :  { %v780_v40 = vpop.f32.mrf.mxu1 }
 0x1bf   :  { %v1466_v43 = vpop.f32.mrf.mxu1 }
 0x1c5   :  { %v629_v44 = vpop.f32.mrf.mxu0 }
 0x1c6   :  { %v630_v57 = vadd.f32 %v629_v44, %v524_v56 }
 0x1c7   :  { %v1431_v45 = vpop.f32.mrf.mxu0 }
 0x1c8   :  { %v781_v3 = vadd.f32 %v780_v40, %v630_v57 }
 0x1dd   :  { %v973_v49 = vpop.f32.mrf.mxu1 }
 0x1df   :  { %v1536_v50 = vpop.f32.mrf.mxu1 }
 0x1e6   :  { %v884_v51 = vpop.f32.mrf.mxu0 }
 0x1e7   :  { %v885_v63 = vadd.f32 %v884_v51, %v781_v3 }
 0x1e8   :  { %v1501_v55 = vpop.f32.mrf.mxu0 }
 0x1e9   :  { %v974_v2 = vadd.f32 %v973_v49, %v885_v63 }
 0x1ff   :  { %v1179_v61 = vpop.f32.mrf.mxu1 }
 0x201   :  { %v1606_v62 = vpop.f32.mrf.mxu1 }
 0x207   :  { %v1092_v4 = vpop.f32.mrf.mxu0 }
 0x208   :  { %v1093_v5 = vadd.f32 %v1092_v4, %v974_v2 }
 0x209   :  { %v1571_v9 = vpop.f32.mrf.mxu0 }
 0x20a   :  { %v1180_v10 = vadd.f32 %v1179_v61, %v1093_v5 }
 0x20c   :  { %1183 = vst.msk [vmem:[#allocation2] sm:$0xff] %vm33_vm0, %v1180_v10 }
 0x20d   :  { %1623 = shalt.err (!%p1620_p4)
}
 0x20e   :  { %1193 = dma.vmem_to_hbm [thread:$0]  %s1191_s11, 128, %s2174_s5, [#allocation3]  }
 0x20f   :  { %1632 = dma.done.wait [#allocation3], 128  }
 0x210   :  { %1633 = vsyncadd [#allocation3], 4294967168 }
 0x211   :  { %1197 = vsyncpa [#allocation3], 1 }

</bundles_post_ra>
